<compile_context>
chip_gen: v7x
topology: tpu7x:2x2x1
jax: 0.10.0
libtpu: 0.0.40
codegen_flags: <defaults>
</compile_context>

<pallas_src>
import jax
import jax.numpy as jnp
from jax.experimental import pallas as pl
from jax.experimental.pallas import tpu as pltpu

_TARGET_CHUNK_BYTES = 8 * 1024 * 1024   # ~8 MiB contiguous DMA bursts
_MAX_CHUNKS = 16


def _chunk_bounds(rows: int, row_bytes: int):
    """Static (start, size) row-ranges covering [0, rows), ~8 MiB each."""
    total_bytes = rows * row_bytes
    nchunks = max(1, min(_MAX_CHUNKS, -(-total_bytes // _TARGET_CHUNK_BYTES)))
    nchunks = min(nchunks, rows)
    base, rem = divmod(rows, nchunks)
    bounds, start = [], 0
    for i in range(nchunks):
        size = base + (1 if i < rem else 0)
        if size > 0:
            bounds.append((start, size))
            start += size
    return bounds


def _make_dma_copy_kernel(bounds):
    """Kernel: issue one HBM->HBM DMA per static chunk, then wait on all."""
    def kernel(x_hbm, o_hbm, sem):
        copies = []
        for idx, (start, size) in enumerate(bounds):
            cp = pltpu.make_async_copy(
                x_hbm.at[pl.ds(start, size)],
                o_hbm.at[pl.ds(start, size)],
                sem.at[idx],
            )
            cp.start()
            copies.append(cp)
        for cp in copies:
            cp.wait()
    return kernel


def _identity_dma_copy_2d(x2d: jax.Array) -> jax.Array:
    """Pallas HBM->HBM DMA copy of a 2D array (no VMEM staging)."""
    R, W = x2d.shape
    itemsize = jnp.dtype(x2d.dtype).itemsize
    bounds = _chunk_bounds(R, W * itemsize)

    return pl.pallas_call(
        _make_dma_copy_kernel(bounds),
        out_shape=jax.ShapeDtypeStruct((R, W), x2d.dtype),
        in_specs=[pl.BlockSpec(memory_space=pl.ANY)],
        out_specs=pl.BlockSpec(memory_space=pl.ANY),
        scratch_shapes=[pltpu.SemaphoreType.DMA((len(bounds),))],
        cost_estimate=pl.CostEstimate(
            flops=0,
            transcendentals=0,
            bytes_accessed=2 * R * W * itemsize,
        ),
    )(x2d)


def flatten_consecutive(x: jax.Array, n: int) -> jax.Array:
    """Pallas implementation of FlattenConsecutive(n).forward(x)."""
    N, L, C = x.shape
    assert L % n == 0, f"L={L} must be divisible by n={n}"
    L_out, C_out = L // n, C * n

    # Free metadata reshape: present the contiguous bytes as (rows, C*n).
    x2d = jnp.reshape(x, (N * L_out, C_out))

    out2d = _identity_dma_copy_2d(x2d)

    # Free metadata reshape back to the module's output shape (+ squeeze).
    out = jnp.reshape(out2d, (N, L_out, C_out))
    if L_out == 1:                      # match torch's squeeze(1)
        out = jnp.squeeze(out, axis=1)
    return out


def _reference(x, n):
    N, L, C = x.shape
    y = jnp.reshape(x, (N, L // n, C * n))
    if y.shape[1] == 1:
        y = jnp.squeeze(y, axis=1)
    return y


if __name__ == "__main__":
    key = jax.random.PRNGKey(0)

    # Small shape consistent with the module: batch=2, seq=8, channels=4, n=2.
    N, L, C, n = 2, 8, 4, 2
    x = jax.random.normal(key, (N, L, C), dtype=jnp.float32)
    y = jax.block_until_ready(flatten_consecutive(x, n))
    assert y.shape == (N, L // n, C * n), y.shape
    assert jnp.array_equal(y, _reference(x, n)), "mismatch (small case)"

    # Squeeze path: middle dim collapses to 1 -> (N, C*n).
    x2 = jax.random.normal(jax.random.PRNGKey(1), (N, n, C), dtype=jnp.float32)
    y2 = jax.block_until_ready(flatten_consecutive(x2, n))
    assert y2.shape == (N, C * n), y2.shape
    assert jnp.array_equal(y2, _reference(x2, n)), "mismatch (squeeze case)"

    # Multi-chunk DMA path: 64 rows of 256 f32 -> several static chunks.
    N3, L3, C3, n3 = 4, 64, 64, 4
    x3 = jax.random.normal(jax.random.PRNGKey(2), (N3, L3, C3),
                           dtype=jnp.float32)
    y3 = jax.block_until_ready(flatten_consecutive(x3, n3))
    assert y3.shape == (N3, L3 // n3, C3 * n3), y3.shape
    assert jnp.array_equal(y3, _reference(x3, n3)), "mismatch (chunked case)"

    # Shape whose element count is not a multiple of 128 (old fallback path).
    x4 = jax.random.normal(jax.random.PRNGKey(3), (3, 6, 5), dtype=jnp.float32)
    y4 = jax.block_until_ready(flatten_consecutive(x4, 3))
    assert y4.shape == (3, 2, 15), y4.shape
    assert jnp.array_equal(y4, _reference(x4, 3)), "mismatch (odd-shape case)"

    print("KERNEL_OK")
</pallas_src>

<mosaic_0001>
module attributes {stable_mosaic.version = 11 : i64} {
  func.func @kernel(%arg0: memref<8x8xf32, #tpu.memory_space<any>>, %arg1: memref<8x8xf32, #tpu.memory_space<any>>, %arg2: memref<1x!tpu.dma_semaphore, #tpu.memory_space<semaphore_mem>>) attributes {dimension_semantics = [], scalar_prefetch = 0 : i64, scratch_operands = 1 : i64, tpu.core_type = #tpu.core_type<tc>} {
    %c0_i32 = arith.constant 0 : i32
    %c0_i32_0 = arith.constant 0 : i32
    %c0_i32_1 = arith.constant 0 : i32
    %0 = tpu.memref_slice %arg0[%c0_i32_0, %c0_i32_1] : memref<8x8xf32, #tpu.memory_space<any>> -> memref<8x8xf32, #tpu.memory_space<any>>
    %c0_i32_2 = arith.constant 0 : i32
    %c0_i32_3 = arith.constant 0 : i32
    %1 = tpu.memref_slice %arg1[%c0_i32_2, %c0_i32_3] : memref<8x8xf32, #tpu.memory_space<any>> -> memref<8x8xf32, #tpu.memory_space<any>>
    %2 = tpu.memref_slice %arg2[%c0_i32] : memref<1x!tpu.dma_semaphore, #tpu.memory_space<semaphore_mem>> -> memref<1x!tpu.dma_semaphore, #tpu.memory_space<semaphore_mem>>
    %3 = tpu.memref_squeeze %2 : memref<1x!tpu.dma_semaphore, #tpu.memory_space<semaphore_mem>> -> memref<!tpu.dma_semaphore, #tpu.memory_space<semaphore_mem>>
    tpu.enqueue_dma source(%0 : memref<8x8xf32, #tpu.memory_space<any>>) target(%1 : memref<8x8xf32, #tpu.memory_space<any>>) target_semaphore(%3 : memref<!tpu.dma_semaphore, #tpu.memory_space<semaphore_mem>>)
    %c0_i32_4 = arith.constant 0 : i32
    %c0_i32_5 = arith.constant 0 : i32
    %c0_i32_6 = arith.constant 0 : i32
    %4 = tpu.memref_slice %arg0[%c0_i32_5, %c0_i32_6] : memref<8x8xf32, #tpu.memory_space<any>> -> memref<8x8xf32, #tpu.memory_space<any>>
    %c0_i32_7 = arith.constant 0 : i32
    %c0_i32_8 = arith.constant 0 : i32
    %5 = tpu.memref_slice %arg1[%c0_i32_7, %c0_i32_8] : memref<8x8xf32, #tpu.memory_space<any>> -> memref<8x8xf32, #tpu.memory_space<any>>
    %6 = tpu.memref_slice %arg2[%c0_i32_4] : memref<1x!tpu.dma_semaphore, #tpu.memory_space<semaphore_mem>> -> memref<1x!tpu.dma_semaphore, #tpu.memory_space<semaphore_mem>>
    %7 = tpu.memref_squeeze %6 : memref<1x!tpu.dma_semaphore, #tpu.memory_space<semaphore_mem>> -> memref<!tpu.dma_semaphore, #tpu.memory_space<semaphore_mem>>
    tpu.wait_dma2 semaphore(%7 : memref<!tpu.dma_semaphore, #tpu.memory_space<semaphore_mem>>) src(%4 : memref<8x8xf32, #tpu.memory_space<any>>) dst(%5 : memref<8x8xf32, #tpu.memory_space<any>>)
    return
  }
}

</mosaic_0001>

<bundles_post_ra>
// kernel: tpu_custom_call.1
= control target key start
LH: loop header
LB: loop body
LE: loop exit
PB: predicated region body
PF: predicated region fallthrough
CT: control target
= control target key end

     0   :  { %s34_s6 = smov [#allocation2]   ;;  %s35_s7 = smov [#allocation3]   ;;  %s53_s0 = inlined_call_operand.hbm [shape: f32[8,8], index: 0, kind: input, shape index: {}]   ;;  %s54_s1 = inlined_call_operand.hbm [shape: f32[8,8], index: 1, kind: output, shape index: {}]  }
   0x1   :  { %s36_s8 = smov 0  }
   0x2   :  { %18 = dma.general %s53_s0, 128, %s54_s1, %s34_s6, %s35_s7, [#allocation4], %s36_s8, 0  }
   0x3   :  { %32 = dma.done.wait [#allocation2], 128 }
   0x4   :  { %33 = vsyncadd [#allocation2], 4294967168 }
   0x5   :  { %22 = vsyncmov [#allocation2] }
   0x8   :  { %s23_s13 = vpop.sfrf %22 }
   0x9   :  { %p28_p0 = scmp.ne.s32.totalorder %s23_s13, 0 }
   0xb   :  { %27 = shalt.err (%p28_p0)  }

</bundles_post_ra>
